<compile_context>
chip_gen: v6e
topology: v6e:2x2x1
jax: 0.10.0
libtpu: 0.0.40
codegen_flags: <defaults>
</compile_context>

<pallas_src>
import numpy as np

import jax
import jax.numpy as jnp
from jax.experimental import pallas as pl
from jax.experimental.pallas import tpu as pltpu

# ACTION_INDS is an undeclared global in the reference file; choose a
# deterministic set of action column indices for this synthetic port.
ACTION_INDS = (0, 1, 2, 3)

_LANE = 128             # lane tile
_ACC_SUB = 8            # f32 sublane tile (accumulator height)
_MAX_BLOCK_ROWS = 2048  # (2048, 128) f32 block = 1 MiB per buffer
_NUM_CORES = 2          # shard long reductions across 2 TCs (v7x); neutral on 1-TC chips


def _cdiv(a, b):
    return -(-a // b)


def _round_up(a, b):
    return _cdiv(a, b) * b


def _fused_wsse_kernel(y_ref, p_ref, w_ref, o_ref, acc_ref):
    """Accumulate sum(w_row * (y - p)^2) over row tiles.

    y_ref/p_ref: (block_rows, 128) tiles in the incoming float dtype.
    w_ref:       (block_rows, 1) f32 per-row weights (lambda / n_elems; 0 on pad).
    o_ref:       (1, 8, 128) per-core partial-sum slab.
    acc_ref:     (8, 128) f32 running accumulator (persists across inner steps).
    """
    @pl.when(pl.program_id(1) == 0)
    def _():
        acc_ref[...] = jnp.zeros_like(acc_ref)

    d = y_ref[...].astype(jnp.float32) - p_ref[...].astype(jnp.float32)
    wd = w_ref[...] * d * d                                # (rows,1) lane-broadcast
    # Fold the block down to an (8,128) vreg-shaped partial (pure VPU adds).
    acc_ref[...] += jnp.sum(wd.reshape(-1, _ACC_SUB, _LANE), axis=0)

    @pl.when(pl.program_id(1) == pl.num_programs(1) - 1)
    def _():
        o_ref[0] = acc_ref[...]


def fused_weighted_mse(terms):
    """terms: list of (y, pred, weight) with Python-float weights.

    Returns sum_i weight_i * mean((y_i - pred_i)^2) with ONE pallas_call,
    regardless of the number of terms.
    """
    if not terms:
        return jnp.float32(0.0)

    # Common on-the-wire dtype, clamped to <=32-bit float (TPU has no f64).
    in_dtype = jnp.result_type(*(jnp.asarray(x).dtype for t in terms for x in t[:2]))
    if (not jnp.issubdtype(in_dtype, jnp.floating)) or in_dtype == jnp.float64:
        in_dtype = jnp.float32
    itemsize = np.dtype(in_dtype).itemsize
    sub = {4: 8, 2: 16, 1: 32}.get(itemsize, 8)   # packed sublane tile for dtype

    # TODO(synk): for very large individual terms, stream them as separate
    # pallas inputs (own BlockSpec + per-input weight column) instead of
    # materialising a concatenated copy here; the concat path is kept because
    # this workload is many tiny terms.
    ys, ps, w_rows = [], [], []
    for (y, p, w) in terms:
        yf = jnp.asarray(y, in_dtype).reshape(-1)
        pf = jnp.asarray(p, in_dtype).reshape(-1)
        n = yf.size
        rows_t = _cdiv(n, _LANE)
        pad_t = rows_t * _LANE - n
        if pad_t:
            # Zero pad => (y - p) == 0 there, contributes nothing.
            yf = jnp.pad(yf, (0, pad_t))
            pf = jnp.pad(pf, (0, pad_t))
        ys.append(yf)
        ps.append(pf)
        # One weight per 128-lane row; weight / n folds the per-term mean
        # into the global weighted sum.  Host-side numpy -> baked constant.
        w_rows.append(np.full((rows_t,), float(w) / float(n), np.float32))

    y_all = ys[0] if len(ys) == 1 else jnp.concatenate(ys)
    p_all = ps[0] if len(ps) == 1 else jnp.concatenate(ps)
    w_col = np.concatenate(w_rows) if len(w_rows) > 1 else w_rows[0]

    rows = y_all.size // _LANE

    # Tiling: shard across 2 cores only when there is more than one max block.
    num_cores = _NUM_CORES if rows > _MAX_BLOCK_ROWS else 1
    chunk = _cdiv(rows, num_cores)
    block_rows = min(_MAX_BLOCK_ROWS, _round_up(chunk, sub))
    steps_per_core = _cdiv(chunk, block_rows)
    padded_rows = num_cores * steps_per_core * block_rows

    pad_rows = padded_rows - rows
    if pad_rows:
        y_all = jnp.pad(y_all, (0, pad_rows * _LANE))
        p_all = jnp.pad(p_all, (0, pad_rows * _LANE))
    w_col = np.pad(w_col, (0, pad_rows)).reshape(padded_rows, 1)  # host constant

    y2 = y_all.reshape(padded_rows, _LANE)
    p2 = p_all.reshape(padded_rows, _LANE)

    def inp_map(c, i):
        return (c * steps_per_core + i, 0)

    out = pl.pallas_call(
        _fused_wsse_kernel,
        out_shape=jax.ShapeDtypeStruct((num_cores, _ACC_SUB, _LANE), jnp.float32),
        grid_spec=pltpu.PrefetchScalarGridSpec(
            num_scalar_prefetch=0,
            grid=(num_cores, steps_per_core),
            in_specs=[
                pl.BlockSpec((block_rows, _LANE), inp_map),
                pl.BlockSpec((block_rows, _LANE), inp_map),
                pl.BlockSpec((block_rows, 1), inp_map),
            ],
            out_specs=pl.BlockSpec((1, _ACC_SUB, _LANE), lambda c, i: (c, 0, 0)),
            scratch_shapes=[pltpu.VMEM((_ACC_SUB, _LANE), jnp.float32)],
        ),
        compiler_params=pltpu.CompilerParams(
            dimension_semantics=("parallel", "arbitrary")),
    )(y2, p2, jnp.asarray(w_col))

    # Tiny trailing reduction (num_cores x 8 x 128) in plain JAX.
    return jnp.sum(out)


def pallas_mse(y, pred):
    """Plain MSE between two same-shaped arrays (single-term fused path)."""
    return fused_weighted_mse([(y, pred, 1.0)])


class DecoupleDynamicsModelLoss:
    """Forward-pass-only JAX/Pallas port of the PyTorch module.

    All MSE terms are fused into a single Pallas launch per __call__.
    `.detach()` in the reference only affects gradients; the forward value is
    identical, so it is dropped here.  Lambda weights must be Python floats.
    """

    def __init__(self, **kwargs):
        self._lambda = kwargs
        self.use_X = kwargs['use_X']

    # Kept for API parity with the reference module.
    def reconstruction_loss(self, y, pred):
        return pallas_mse(y, pred)

    def state_loss(self, y, pred):
        return pallas_mse(y, pred)

    def forward_model_loss(self, y, pred):
        return pallas_mse(y, pred)

    def inverse_loss(self, y, pred):
        return pallas_mse(y, pred)

    def __call__(self, model_output, input_modalities, lengths):
        size = len(model_output)
        terms = []  # (y, pred, weight) with weight = lambda / size
        for model_dict in model_output:
            if self.use_X:
                action_pred = (model_dict['state_t1'][0]
                               - model_dict['state_t0'][0])[:, tuple(ACTION_INDS)]
                model_dict['action_t0_pred'] = action_pred  # preserve reference side effect
                terms.append((model_dict['action_t0'], action_pred,
                              self._lambda['lambda_inverse'] / size))
            terms.append((model_dict['embed_t1'], model_dict['embed_t1_pred'],
                          self._lambda['lambda_forward'] / size))
            for m in range(len(model_dict['state_t0'])):
                terms.append((model_dict['state_t0'][m], model_dict['state_t0_pred'][m],
                              self._lambda['lambda_decoder'] / size))
                terms.append((model_dict['state_t1'][m], model_dict['state_t1_pred'][m],
                              self._lambda['lambda_decoder'] / size))
        return fused_weighted_mse(terms)


def _ref_mse(y, p):
    return jnp.mean((y.astype(jnp.float32) - p.astype(jnp.float32)) ** 2)


if __name__ == "__main__":
    key = jax.random.PRNGKey(0)

    B = 8            # batch
    D0, D1 = 16, 32  # two state modalities
    H = 32           # embedding dim
    SIZE = 2         # len(model_output)

    def nxt():
        global key
        key, sub = jax.random.split(key)
        return sub

    model_output = []
    for _ in range(SIZE):
        s_t0 = [jax.random.normal(nxt(), (B, D0), jnp.float32),
                jax.random.normal(nxt(), (B, D1), jnp.float32)]
        s_t0_pred = [jax.random.normal(nxt(), (B, D0), jnp.float32),
                     jax.random.normal(nxt(), (B, D1), jnp.float32)]
        s_t1 = [jax.random.normal(nxt(), (B, D0), jnp.float32),
                jax.random.normal(nxt(), (B, D1), jnp.float32)]
        s_t1_pred = [jax.random.normal(nxt(), (B, D0), jnp.float32),
                     jax.random.normal(nxt(), (B, D1), jnp.float32)]
        model_output.append({
            'state_t0': s_t0, 'state_t0_pred': s_t0_pred,
            'state_t1': s_t1, 'state_t1_pred': s_t1_pred,
            'embed_t1': jax.random.normal(nxt(), (B, H), jnp.float32),
            'embed_t1_pred': jax.random.normal(nxt(), (B, H), jnp.float32),
            'action_t0': jax.random.normal(nxt(), (B, len(ACTION_INDS)),
                                           jnp.float32),
        })

    input_modalities = None  # unused by forward (matches reference)
    lengths = None           # unused by forward (matches reference)

    loss_fn = DecoupleDynamicsModelLoss(
        use_X=True, lambda_forward=1.0, lambda_inverse=0.5, lambda_decoder=0.1)

    out = loss_fn(model_output, input_modalities, lengths)
    out = jax.block_until_ready(out)

    # Reference check in plain JAX.
    ref = jnp.float32(0.0)
    for md in model_output:
        ap = (md['state_t1'][0] - md['state_t0'][0])[:, tuple(ACTION_INDS)]
        ref = ref + 1.0 * _ref_mse(md['embed_t1'], md['embed_t1_pred']) \
                  + 0.5 * _ref_mse(md['action_t0'], ap)
        for m in range(len(md['state_t0'])):
            ref = ref + 0.1 * (_ref_mse(md['state_t0'][m], md['state_t0_pred'][m])
                               + _ref_mse(md['state_t1'][m], md['state_t1_pred'][m]))
    ref = ref / SIZE

    assert jnp.allclose(out, ref, rtol=1e-5, atol=1e-5), (out, ref)

    # Secondary sanity check: exercises the two-core parallel split, multi-step
    # inner grid, bf16 on the wire, and row-tail padding (521 % 128 != 0).
    yb = jax.random.normal(nxt(), (1023, 521), jnp.bfloat16)
    pb = jax.random.normal(nxt(), (1023, 521), jnp.bfloat16)
    got = jax.block_until_ready(pallas_mse(yb, pb))
    want = _ref_mse(yb, pb)
    assert jnp.allclose(got, want, rtol=1e-4, atol=1e-5), (got, want)

    print("KERNEL_OK")
</pallas_src>

<mosaic_0001>
module attributes {stable_mosaic.version = 11 : i64} {
  func.func @_fused_wsse_kernel(%arg0: i32, %arg1: i32, %arg2: memref<24x128xf32, #tpu.memory_space<vmem>>, %arg3: memref<24x128xf32, #tpu.memory_space<vmem>>, %arg4: memref<24x1xf32, #tpu.memory_space<vmem>>, %arg5: memref<1x8x128xf32, #tpu.memory_space<vmem>>, %arg6: memref<8x128xf32, #tpu.memory_space<vmem>>) attributes {dimension_semantics = [#tpu.dimension_semantics<parallel>, #tpu.dimension_semantics<arbitrary>], iteration_bounds = array<i64: 1, 1>, scalar_prefetch = 0 : i64, scratch_operands = 1 : i64, tpu.core_type = #tpu.core_type<tc>, window_params = [{transform_indices = @transform_0, window_bounds = array<i64: 24, 128>}, {transform_indices = @transform_1, window_bounds = array<i64: 24, 128>}, {transform_indices = @transform_2, window_bounds = array<i64: 24, 1>}, {transform_indices = @transform_3, window_bounds = array<i64: 1, 8, 128>}]} {
    %c0_i32 = arith.constant 0 : i32
    %0 = arith.cmpi eq, %arg1, %c0_i32 : i32
    %1 = arith.extui %0 : i1 to i32
    %c0_i32_0 = arith.constant 0 : i32
    %2 = arith.cmpi ne, %1, %c0_i32_0 : i32
    scf.if %2 {
      %cst_12 = arith.constant 0.000000e+00 : f32
      %18 = vector.broadcast %cst_12 : f32 to vector<8x128xf32>
      %c0_13 = arith.constant 0 : index
      %c0_14 = arith.constant 0 : index
      %19 = vector.load %arg6[%c0_13, %c0_14] : memref<8x128xf32, #tpu.memory_space<vmem>>, vector<8x128xf32>
      tpu.vector_store %arg6[%c0_13, %c0_14], %18 {strides = array<i32>} : memref<8x128xf32, #tpu.memory_space<vmem>>, vector<8x128xf32>,
    } else {
    }
    %c0 = arith.constant 0 : index
    %c0_1 = arith.constant 0 : index
    %3 = vector.load %arg2[%c0, %c0_1] : memref<24x128xf32, #tpu.memory_space<vmem>>, vector<24x128xf32>
    %c0_2 = arith.constant 0 : index
    %c0_3 = arith.constant 0 : index
    %4 = vector.load %arg3[%c0_2, %c0_3] : memref<24x128xf32, #tpu.memory_space<vmem>>, vector<24x128xf32>
    %5 = arith.subf %3, %4 : vector<24x128xf32>
    %c0_4 = arith.constant 0 : index
    %c0_5 = arith.constant 0 : index
    %6 = vector.load %arg4[%c0_4, %c0_5] : memref<24x1xf32, #tpu.memory_space<vmem>>, vector<24x1xf32>
    %7 = vector.broadcast %6 : vector<24x1xf32> to vector<24x128xf32>
    %8 = arith.mulf %7, %5 : vector<24x128xf32>
    %9 = arith.mulf %8, %5 : vector<24x128xf32>
    %c0_6 = arith.constant 0 : index
    %c0_7 = arith.constant 0 : index
    %10 = vector.load %arg6[%c0_6, %c0_7] : memref<8x128xf32, #tpu.memory_space<vmem>>, vector<8x128xf32>
    %11 = vector.shape_cast %9 : vector<24x128xf32> to vector<3x8x128xf32>
    %cst = arith.constant dense<0.000000e+00> : vector<8x128xf32>
    %12 = vector.multi_reduction <add>, %11, %cst [0] : vector<3x8x128xf32> to vector<8x128xf32>
    %13 = arith.addf %10, %12 : vector<8x128xf32>
    %c0_8 = arith.constant 0 : index
    %c0_9 = arith.constant 0 : index
    %14 = vector.load %arg6[%c0_8, %c0_9] : memref<8x128xf32, #tpu.memory_space<vmem>>, vector<8x128xf32>
    tpu.vector_store %arg6[%c0_8, %c0_9], %13 {strides = array<i32>} : memref<8x128xf32, #tpu.memory_space<vmem>>, vector<8x128xf32>,
    %c0_i32_10 = arith.constant 0 : i32
    %15 = arith.cmpi eq, %arg1, %c0_i32_10 : i32
    %16 = arith.extui %15 : i1 to i32
    %c0_i32_11 = arith.constant 0 : i32
    %17 = arith.cmpi ne, %16, %c0_i32_11 : i32
    scf.if %17 {
      %c0_12 = arith.constant 0 : index
      %c0_13 = arith.constant 0 : index
      %18 = vector.load %arg6[%c0_12, %c0_13] : memref<8x128xf32, #tpu.memory_space<vmem>>, vector<8x128xf32>
      %c0_14 = arith.constant 0 : index
      %c0_15 = arith.constant 0 : index
      %c0_16 = arith.constant 0 : index
      %19 = vector.load %arg5[%c0_14, %c0_15, %c0_16] : memref<1x8x128xf32, #tpu.memory_space<vmem>>, vector<1x8x128xf32>
      %20 = vector.shape_cast %19 : vector<1x8x128xf32> to vector<8x128xf32>
      %21 = vector.shape_cast %18 : vector<8x128xf32> to vector<1x8x128xf32>
      tpu.vector_store %arg5[%c0_14, %c0_15, %c0_16], %21 {strides = array<i32>} : memref<1x8x128xf32, #tpu.memory_space<vmem>>, vector<1x8x128xf32>,
    } else {
    }
    return
  }
  func.func @transform_0(%arg0: i32, %arg1: i32) -> (i32, i32) {
    %c1_i32 = arith.constant 1 : i32
    %0 = arith.muli %arg0, %c1_i32 : i32
    %1 = arith.addi %0, %arg1 : i32
    %c0_i32 = arith.constant 0 : i32
    %c0_i32_0 = arith.constant 0 : i32
    return %1, %c0_i32 : i32, i32
  }
  func.func @transform_1(%arg0: i32, %arg1: i32) -> (i32, i32) {
    %c1_i32 = arith.constant 1 : i32
    %0 = arith.muli %arg0, %c1_i32 : i32
    %1 = arith.addi %0, %arg1 : i32
    %c0_i32 = arith.constant 0 : i32
    %c0_i32_0 = arith.constant 0 : i32
    return %1, %c0_i32 : i32, i32
  }
  func.func @transform_2(%arg0: i32, %arg1: i32) -> (i32, i32) {
    %c1_i32 = arith.constant 1 : i32
    %0 = arith.muli %arg0, %c1_i32 : i32
    %1 = arith.addi %0, %arg1 : i32
    %c0_i32 = arith.constant 0 : i32
    %c0_i32_0 = arith.constant 0 : i32
    return %1, %c0_i32 : i32, i32
  }
  func.func @transform_3(%arg0: i32, %arg1: i32) -> (i32, i32, i32) {
    %c0_i32 = arith.constant 0 : i32
    %c0_i32_0 = arith.constant 0 : i32
    %c0_i32_1 = arith.constant 0 : i32
    return %arg0, %c0_i32, %c0_i32_0 : i32, i32, i32
  }
}

</mosaic_0001>

<bundles_post_ra>
// kernel: tpu_custom_call.1
= control target key start
LH: loop header
LB: loop body
LE: loop exit
PB: predicated region body
PF: predicated region fallthrough
CT: control target
= control target key end

     0   :  { %8 = vsyncpa [#allocation4], 0  ;;  %s254_s0 = inlined_call_operand.vmem [shape: f32[24,128], index: 0, kind: input, shape index: {}]   ;;  %s255_s1 = inlined_call_operand.hbm [shape: f32[24,128], index: 1, kind: input, shape index: {}]   ;;  %s256_s2 = inlined_call_operand.vmem [shape: f32[24,1], index: 2, kind: input, shape index: {}]   ;;  %s257_s3 = inlined_call_operand.hbm [shape: f32[1,8,128], index: 3, kind: output, shape index: {}]  }
   0x1   :  { %9 = vsyncpa [#allocation5], 0  ;;  %s205_s12 = smov [#allocation3]  }
   0x2   :  { %s29_s13 = sshll.u32 %s205_s12, 4  ;;  %s30_s13 = int_to_ptr.vmem [resolvable:$true] %s29_s13 }
   0x3   :  { %s169_s14 = scalar_lea.vmem %s30_s13, 384  ;;  %p174_p1 = scmp.lt.s32.totalorder %s30_s13, %s30_s13 }
   0x4   :  { %p170_p0 = scmp.ne.s32.totalorder %s30_s13, %s169_s14  ;;  %p175_p2 = scmp.lt.s32.totalorder %s169_s14, %s169_s14 }
   0x6   :  { %p176_p3 = por %p175_p2, %p174_p1 }
   0x8   :  { %p177_p4 = pnand %p176_p3, %p170_p0 }
   0xa   :  { %180 = shalt.err (!%p177_p4)
}
   0xb   :  { %s206_s15 = smov 128   ;;  %s207_s16 = smov 8  }
   0xc   :  { %35 = dma.hbm_to_vmem [thread:$0]  %s255_s1, 384, %s30_s13, [#allocation4], %s206_s15, %s206_s15, %s207_s16  }
   0xd   :  { %201 = dma.done.wait [#allocation4], 384  }
   0xe   :  { %202 = vsyncadd [#allocation4], 4294966912  ;;  %v208_v0 = vmov 0   ;;  %v93_v1 = vld [vmem:[%s256_s2] sm:$0xff]  ;;  %v95_v2 = vld [vmem:[%s256_s2 + $0x10] sm:$0xff] }
   0xf   :  { %159 = vset.pattern.permute.xlu0 %v208_v0  ;;  %160 = vset.pattern.permute.xlu1 %v208_v0  ;;  %v94_v3 = vld [vmem:[%s256_s2 + $0x8] sm:$0xff]  ;;  %v84_v4 = vld [vmem:[%s254_s0] sm:$0xff]  ;;  %v86_v6 = vld [vmem:[%s254_s0 + $0x10] sm:$0xff]  ;;  %s209_s2 = smov [#allocation6]  }
  0x10   :  { %98 = vperm.xlu0 %159, %v93_v1   ;;  %108 = vperm.xlu1 %160, %v95_v2   ;;  %v87_v5 = vld [vmem:[#allocation3] sm:$0xff]  ;;  %v89_v7 = vld [vmem:[#allocation3 + $0x10] sm:$0xff]  ;;  %v85_v8 = vld [vmem:[%s254_s0 + $0x8] sm:$0xff]  ;;  %s133_s30 = sshll.u32 %s209_s2, 4  ;;  %s134_s30 = int_to_ptr.vmem [resolvable:$true] %s133_s30 }
  0x11   :  { %v88_v9 = vld [vmem:[#allocation3 + $0x8] sm:$0xff]  ;;  %v90_v10 = vsub.f32 %v84_v4, %v87_v5  ;;  %v92_v11 = vsub.f32 %v86_v6, %v89_v7  ;;  %s181_s0 = scalar_lea.vmem %s134_s30, 128  ;;  %p186_p6 = scmp.lt.s32.totalorder %s134_s30, %s134_s30 }
  0x12   :  { %v91_v14 = vsub.f32 %v85_v8, %v88_v9  ;;  %p182_p5 = scmp.ne.s32.totalorder %s134_s30, %s181_s0  ;;  %p187_p7 = scmp.lt.s32.totalorder %s181_s0, %s181_s0 }
  0x14   :  { %103 = vperm.xlu0 %159, %v94_v3   ;;  %p188_p8 = por %p187_p7, %p186_p6 }
  0x16   :  { %p189_p9 = pnand %p188_p8, %p182_p5 }
  0x8b   :  { %v99_v12 = vpop.permute.xlu0 %98  ;;  %v109_v13 = vpop.permute.xlu1 %108 }
  0x8c   :  { %v111_v15 = vmul.f32 %v99_v12, %v90_v10  ;;  %v113_v16 = vmul.f32 %v109_v13, %v92_v11 }
  0x8e   :  { %v114_v19 = vmul.f32 %v111_v15, %v90_v10  ;;  %v116_v21 = vmul.f32 %v113_v16, %v92_v11 }
  0x8f   :  { %v104_v17 = vpop.permute.xlu0 %103 }
  0x90   :  { %v112_v18 = vmul.f32 %v104_v17, %v91_v14 }
  0x92   :  { %v115_v20 = vmul.f32 %v112_v18, %v91_v14 }
  0x94   :  { %v118_v22 = vadd.f32 %v115_v20, %v114_v19 }
  0x96   :  { %v119_v23 = vadd.f32 %v118_v22, %v116_v21 }
  0x98   :  { %126 = vst [vmem:[#allocation6] sm:$0xff] %v119_v23 }
  0x99   :  { %192 = shalt.err (!%p189_p9)
}
  0x9a   :  { %136 = dma.vmem_to_hbm [thread:$0]  %s134_s30, 128, %s257_s3, [#allocation5]  }
  0x9b   :  { %203 = dma.done.wait [#allocation5], 128  }
  0x9c   :  { %204 = vsyncadd [#allocation5], 4294967168 }
  0x9d   :  { %140 = vsyncpa [#allocation4], 1 }
  0x9e   :  { %141 = vsyncpa [#allocation5], 1 }

</bundles_post_ra>
